<compile_context>
chip_gen: v5e
topology: v5e:2x2
jax: 0.10.0
libtpu: 0.0.40
codegen_flags: <defaults>
</compile_context>

<pallas_src>
import math

import jax
import jax.numpy as jnp
from jax.experimental import pallas as pl
from jax.experimental.pallas import tpu as pltpu

# ---- model config (small, BERT-like) ----
BATCH = 2
SEQ = 8
HIDDEN = 32
NUM_HEADS = 4
HEAD_SIZE = HIDDEN // NUM_HEADS
LAYER_NORM_EPS = 1e-12


def bert_attention_kernel(
    x_ref,       # (B*S, H)      flattened hidden states (also the residual)
    mask_ref,    # (B*NH, 1, S)  additive attention mask, one row per (batch, head) group
    wqkv_ref,    # (H, 3H)       fused [Wq | Wk | Wv], stored [in, out]
    bqkv_ref,    # (1, 3H)       fused [bq | bk | bv]
    wo_ref,      # (H, H)        output dense weight, stored [in, out]
    bo_ref,      # (1, H)
    gamma_ref,   # (1, H)        LayerNorm weight
    beta_ref,    # (1, H)        LayerNorm bias
    out_ref,     # (B*S, H)
):
    x = x_ref[...]                                           # (N, H), N = B*S

    # --- BertSelfAttention: fused Q/K/V projection (one MXU matmul) ---
    qkv = jnp.dot(x, wqkv_ref[...], preferred_element_type=jnp.float32) + bqkv_ref[...]  # (N, 3H)

    # Split into per-(batch, head) groups: (G, S, Dh) with G = B * NUM_HEADS.
    # Static, tile-aligned sublane/lane slices stacked along a new leading (untiled) axis.
    def heads(col_base):
        slabs = []
        for b in range(BATCH):
            for h in range(NUM_HEADS):
                lo = col_base + h * HEAD_SIZE
                slabs.append(qkv[b * SEQ:(b + 1) * SEQ, lo:lo + HEAD_SIZE])
        return jnp.stack(slabs, axis=0)                      # (G, S, Dh)

    qh = heads(0)
    kh = heads(HIDDEN)
    vh = heads(2 * HIDDEN)

    # --- scaled dot-product attention, batched over all (batch, head) groups ---
    inv_sqrt_d = 1.0 / math.sqrt(HEAD_SIZE)
    scores = jnp.einsum("gqd,gkd->gqk", qh, kh,
                        preferred_element_type=jnp.float32) * inv_sqrt_d     # (G, S, S)
    scores = scores + mask_ref[...]                          # additive mask, one broadcast add

    # numerically stable softmax over the key axis
    scores = scores - jnp.max(scores, axis=-1, keepdims=True)
    probs = jnp.exp(scores)
    probs = probs * pl.reciprocal(jnp.sum(probs, axis=-1, keepdims=True), approx=True)

    # attention_probs dropout is an eval-mode no-op; head_mask not supplied.
    ctx = jnp.einsum("gqk,gkd->gqd", probs, vh,
                     preferred_element_type=jnp.float32)     # (G, S, Dh)

    # Merge heads back to a lane-dense (N, H) slab (== permute(0,2,1,3) + view in torch).
    ctx2d = jnp.concatenate(
        [jnp.concatenate([ctx[b * NUM_HEADS + h] for h in range(NUM_HEADS)], axis=-1)
         for b in range(BATCH)],
        axis=0)                                              # (N, H)

    # --- BertSelfOutput: dense + residual + LayerNorm ---
    y = jnp.dot(ctx2d, wo_ref[...], preferred_element_type=jnp.float32) + bo_ref[...]
    y = y + x                                                # residual (dropout is eval no-op)

    mean = jnp.mean(y, axis=-1, keepdims=True)
    var = jnp.mean(jnp.square(y - mean), axis=-1, keepdims=True)
    y = (y - mean) * jax.lax.rsqrt(var + LAYER_NORM_EPS)
    y = y * gamma_ref[...] + beta_ref[...]

    out_ref[...] = y.astype(out_ref.dtype)


def bert_attention(x, attention_mask, params):
    """x: (B, S, H) float32; attention_mask: BERT additive mask (B, 1, 1, S)."""
    B, S, H = x.shape
    x2d = x.reshape(B * S, H)

    # (B,1,1,S) additive mask -> one row per (batch, head) group, shape (B*NH, 1, S);
    # group ordering is batch-major / head-minor to match the kernel's head stacking.
    mask2d = attention_mask.reshape(B, S).astype(jnp.float32)
    mask_g = jnp.repeat(mask2d, NUM_HEADS, axis=0)[:, None, :]

    # Fuse Q/K/V weights & biases host-side (free; done once).
    wqkv = jnp.concatenate([params["wq"], params["wk"], params["wv"]], axis=1)   # (H, 3H)
    bqkv = jnp.concatenate([params["bq"], params["bk"], params["bv"]], axis=1)   # (1, 3H)

    vmem_spec = lambda: pl.BlockSpec(memory_space=pltpu.MemorySpace.VMEM)

    out2d = pl.pallas_call(
        bert_attention_kernel,
        out_shape=jax.ShapeDtypeStruct((B * S, H), x.dtype),
        in_specs=[vmem_spec() for _ in range(8)],
        out_specs=vmem_spec(),
    )(x2d, mask_g, wqkv, bqkv,
      params["wo"], params["bo"], params["gamma"], params["beta"])

    return out2d.reshape(B, S, H)


def make_params(key):
    """Deterministic parameter init. Weights stored as [in, out] (pre-transposed nn.Linear)."""
    ks = jax.random.split(key, 8)
    scale = 0.02
    return {
        "wq": scale * jax.random.normal(ks[0], (HIDDEN, HIDDEN), jnp.float32),
        "bq": scale * jax.random.normal(ks[1], (1, HIDDEN), jnp.float32),
        "wk": scale * jax.random.normal(ks[2], (HIDDEN, HIDDEN), jnp.float32),
        "bk": scale * jax.random.normal(ks[3], (1, HIDDEN), jnp.float32),
        "wv": scale * jax.random.normal(ks[4], (HIDDEN, HIDDEN), jnp.float32),
        "bv": scale * jax.random.normal(ks[5], (1, HIDDEN), jnp.float32),
        "wo": scale * jax.random.normal(ks[6], (HIDDEN, HIDDEN), jnp.float32),
        "bo": scale * jax.random.normal(ks[7], (1, HIDDEN), jnp.float32),
        "gamma": jnp.ones((1, HIDDEN), jnp.float32),
        "beta": jnp.zeros((1, HIDDEN), jnp.float32),
    }


def reference_bert_attention(x, attention_mask, params):
    """Pure-JAX reference mirroring the PyTorch forward (eval mode)."""
    B, S, H = x.shape
    q = x @ params["wq"] + params["bq"]
    k = x @ params["wk"] + params["bk"]
    v = x @ params["wv"] + params["bv"]

    def split_heads(t):
        return t.reshape(B, S, NUM_HEADS, HEAD_SIZE).transpose(0, 2, 1, 3)

    qh, kh, vh = split_heads(q), split_heads(k), split_heads(v)
    scores = jnp.einsum("bhqd,bhkd->bhqk", qh, kh) / math.sqrt(HEAD_SIZE)
    scores = scores + attention_mask  # (B,1,1,S) broadcast
    probs = jax.nn.softmax(scores, axis=-1)
    ctx = jnp.einsum("bhqk,bhkd->bhqd", probs, vh)
    ctx = ctx.transpose(0, 2, 1, 3).reshape(B, S, H)

    y = ctx @ params["wo"] + params["bo"]
    y = y + x
    mean = jnp.mean(y, axis=-1, keepdims=True)
    var = jnp.mean(jnp.square(y - mean), axis=-1, keepdims=True)
    y = (y - mean) / jnp.sqrt(var + LAYER_NORM_EPS)
    return y * params["gamma"] + params["beta"]


if __name__ == "__main__":
    key = jax.random.PRNGKey(0)
    kx, kmask, kp = jax.random.split(key, 3)

    x = jax.random.normal(kx, (BATCH, SEQ, HIDDEN), jnp.float32)

    # BERT-style additive mask: last 2 tokens of batch 1 are padded (-10000).
    valid = jnp.ones((BATCH, SEQ), jnp.float32)
    valid = valid.at[1, -2:].set(0.0)
    attention_mask = (1.0 - valid)[:, None, None, :] * -10000.0   # (B,1,1,S)

    params = make_params(kp)

    out = bert_attention(x, attention_mask, params)
    out = jax.block_until_ready(out)

    ref = reference_bert_attention(x, attention_mask, params)
    assert out.shape == (BATCH, SEQ, HIDDEN)
    # tolerance accounts for the approx (EUP) reciprocal in the softmax denominator
    assert jnp.allclose(out, ref, atol=1e-3, rtol=1e-3), "mismatch vs JAX reference"

    print("KERNEL_OK")
</pallas_src>

<mosaic_0001>
module attributes {stable_mosaic.version = 11 : i64} {
  func.func @bert_attention_kernel(%arg0: memref<16x32xf32, #tpu.memory_space<vmem>>, %arg1: memref<8x1x8xf32, #tpu.memory_space<vmem>>, %arg2: memref<32x96xf32, #tpu.memory_space<vmem>>, %arg3: memref<1x96xf32, #tpu.memory_space<vmem>>, %arg4: memref<32x32xf32, #tpu.memory_space<vmem>>, %arg5: memref<1x32xf32, #tpu.memory_space<vmem>>, %arg6: memref<1x32xf32, #tpu.memory_space<vmem>>, %arg7: memref<1x32xf32, #tpu.memory_space<vmem>>, %arg8: memref<16x32xf32, #tpu.memory_space<vmem>>) attributes {dimension_semantics = [], scalar_prefetch = 0 : i64, scratch_operands = 0 : i64, tpu.core_type = #tpu.core_type<tc>} {
    %c0 = arith.constant 0 : index
    %c0_0 = arith.constant 0 : index
    %0 = vector.load %arg0[%c0, %c0_0] : memref<16x32xf32, #tpu.memory_space<vmem>>, vector<16x32xf32>
    %c0_1 = arith.constant 0 : index
    %c0_2 = arith.constant 0 : index
    %1 = vector.load %arg2[%c0_1, %c0_2] : memref<32x96xf32, #tpu.memory_space<vmem>>, vector<32x96xf32>
    %cst = arith.constant dense<0.000000e+00> : vector<16x96xf32>
    %2 = tpu.matmul %0, %1, %cst {dimension_numbers = #tpu.dot_dimension_numbers<[1], [0], [0], [1], [0, 0, 1, 1], [], []>} : vector<16x32xf32>, vector<32x96xf32>, vector<16x96xf32> -> vector<16x96xf32>
    %c0_3 = arith.constant 0 : index
    %c0_4 = arith.constant 0 : index
    %3 = vector.load %arg3[%c0_3, %c0_4] : memref<1x96xf32, #tpu.memory_space<vmem>>, vector<1x96xf32>
    %4 = vector.broadcast %3 : vector<1x96xf32> to vector<16x96xf32>
    %5 = arith.addf %2, %4 : vector<16x96xf32>
    %6 = vector.extract_strided_slice %5 {offsets = [0, 0], sizes = [8, 8], strides = [1, 1]} : vector<16x96xf32> to vector<8x8xf32>
    %7 = vector.extract_strided_slice %5 {offsets = [0, 8], sizes = [8, 8], strides = [1, 1]} : vector<16x96xf32> to vector<8x8xf32>
    %8 = vector.extract_strided_slice %5 {offsets = [0, 16], sizes = [8, 8], strides = [1, 1]} : vector<16x96xf32> to vector<8x8xf32>
    %9 = vector.extract_strided_slice %5 {offsets = [0, 24], sizes = [8, 8], strides = [1, 1]} : vector<16x96xf32> to vector<8x8xf32>
    %10 = vector.extract_strided_slice %5 {offsets = [8, 0], sizes = [8, 8], strides = [1, 1]} : vector<16x96xf32> to vector<8x8xf32>
    %11 = vector.extract_strided_slice %5 {offsets = [8, 8], sizes = [8, 8], strides = [1, 1]} : vector<16x96xf32> to vector<8x8xf32>
    %12 = vector.extract_strided_slice %5 {offsets = [8, 16], sizes = [8, 8], strides = [1, 1]} : vector<16x96xf32> to vector<8x8xf32>
    %13 = vector.extract_strided_slice %5 {offsets = [8, 24], sizes = [8, 8], strides = [1, 1]} : vector<16x96xf32> to vector<8x8xf32>
    %14 = vector.shape_cast %6 : vector<8x8xf32> to vector<1x8x8xf32>
    %15 = vector.shape_cast %7 : vector<8x8xf32> to vector<1x8x8xf32>
    %16 = vector.shape_cast %8 : vector<8x8xf32> to vector<1x8x8xf32>
    %17 = vector.shape_cast %9 : vector<8x8xf32> to vector<1x8x8xf32>
    %18 = vector.shape_cast %10 : vector<8x8xf32> to vector<1x8x8xf32>
    %19 = vector.shape_cast %11 : vector<8x8xf32> to vector<1x8x8xf32>
    %20 = vector.shape_cast %12 : vector<8x8xf32> to vector<1x8x8xf32>
    %21 = vector.shape_cast %13 : vector<8x8xf32> to vector<1x8x8xf32>
    %22 = tpu.concatenate %14, %15, %16, %17, %18, %19, %20, %21 in 0 : vector<1x8x8xf32>, vector<1x8x8xf32>, vector<1x8x8xf32>, vector<1x8x8xf32>, vector<1x8x8xf32>, vector<1x8x8xf32>, vector<1x8x8xf32>, vector<1x8x8xf32> -> vector<8x8x8xf32>
    %23 = vector.extract_strided_slice %5 {offsets = [0, 32], sizes = [8, 8], strides = [1, 1]} : vector<16x96xf32> to vector<8x8xf32>
    %24 = vector.extract_strided_slice %5 {offsets = [0, 40], sizes = [8, 8], strides = [1, 1]} : vector<16x96xf32> to vector<8x8xf32>
    %25 = vector.extract_strided_slice %5 {offsets = [0, 48], sizes = [8, 8], strides = [1, 1]} : vector<16x96xf32> to vector<8x8xf32>
    %26 = vector.extract_strided_slice %5 {offsets = [0, 56], sizes = [8, 8], strides = [1, 1]} : vector<16x96xf32> to vector<8x8xf32>
    %27 = vector.extract_strided_slice %5 {offsets = [8, 32], sizes = [8, 8], strides = [1, 1]} : vector<16x96xf32> to vector<8x8xf32>
    %28 = vector.extract_strided_slice %5 {offsets = [8, 40], sizes = [8, 8], strides = [1, 1]} : vector<16x96xf32> to vector<8x8xf32>
    %29 = vector.extract_strided_slice %5 {offsets = [8, 48], sizes = [8, 8], strides = [1, 1]} : vector<16x96xf32> to vector<8x8xf32>
    %30 = vector.extract_strided_slice %5 {offsets = [8, 56], sizes = [8, 8], strides = [1, 1]} : vector<16x96xf32> to vector<8x8xf32>
    %31 = vector.shape_cast %23 : vector<8x8xf32> to vector<1x8x8xf32>
    %32 = vector.shape_cast %24 : vector<8x8xf32> to vector<1x8x8xf32>
    %33 = vector.shape_cast %25 : vector<8x8xf32> to vector<1x8x8xf32>
    %34 = vector.shape_cast %26 : vector<8x8xf32> to vector<1x8x8xf32>
    %35 = vector.shape_cast %27 : vector<8x8xf32> to vector<1x8x8xf32>
    %36 = vector.shape_cast %28 : vector<8x8xf32> to vector<1x8x8xf32>
    %37 = vector.shape_cast %29 : vector<8x8xf32> to vector<1x8x8xf32>
    %38 = vector.shape_cast %30 : vector<8x8xf32> to vector<1x8x8xf32>
    %39 = tpu.concatenate %31, %32, %33, %34, %35, %36, %37, %38 in 0 : vector<1x8x8xf32>, vector<1x8x8xf32>, vector<1x8x8xf32>, vector<1x8x8xf32>, vector<1x8x8xf32>, vector<1x8x8xf32>, vector<1x8x8xf32>, vector<1x8x8xf32> -> vector<8x8x8xf32>
    %40 = vector.extract_strided_slice %5 {offsets = [0, 64], sizes = [8, 8], strides = [1, 1]} : vector<16x96xf32> to vector<8x8xf32>
    %41 = vector.extract_strided_slice %5 {offsets = [0, 72], sizes = [8, 8], strides = [1, 1]} : vector<16x96xf32> to vector<8x8xf32>
    %42 = vector.extract_strided_slice %5 {offsets = [0, 80], sizes = [8, 8], strides = [1, 1]} : vector<16x96xf32> to vector<8x8xf32>
    %43 = vector.extract_strided_slice %5 {offsets = [0, 88], sizes = [8, 8], strides = [1, 1]} : vector<16x96xf32> to vector<8x8xf32>
    %44 = vector.extract_strided_slice %5 {offsets = [8, 64], sizes = [8, 8], strides = [1, 1]} : vector<16x96xf32> to vector<8x8xf32>
    %45 = vector.extract_strided_slice %5 {offsets = [8, 72], sizes = [8, 8], strides = [1, 1]} : vector<16x96xf32> to vector<8x8xf32>
    %46 = vector.extract_strided_slice %5 {offsets = [8, 80], sizes = [8, 8], strides = [1, 1]} : vector<16x96xf32> to vector<8x8xf32>
    %47 = vector.extract_strided_slice %5 {offsets = [8, 88], sizes = [8, 8], strides = [1, 1]} : vector<16x96xf32> to vector<8x8xf32>
    %48 = vector.shape_cast %40 : vector<8x8xf32> to vector<1x8x8xf32>
    %49 = vector.shape_cast %41 : vector<8x8xf32> to vector<1x8x8xf32>
    %50 = vector.shape_cast %42 : vector<8x8xf32> to vector<1x8x8xf32>
    %51 = vector.shape_cast %43 : vector<8x8xf32> to vector<1x8x8xf32>
    %52 = vector.shape_cast %44 : vector<8x8xf32> to vector<1x8x8xf32>
    %53 = vector.shape_cast %45 : vector<8x8xf32> to vector<1x8x8xf32>
    %54 = vector.shape_cast %46 : vector<8x8xf32> to vector<1x8x8xf32>
    %55 = vector.shape_cast %47 : vector<8x8xf32> to vector<1x8x8xf32>
    %56 = tpu.concatenate %48, %49, %50, %51, %52, %53, %54, %55 in 0 : vector<1x8x8xf32>, vector<1x8x8xf32>, vector<1x8x8xf32>, vector<1x8x8xf32>, vector<1x8x8xf32>, vector<1x8x8xf32>, vector<1x8x8xf32>, vector<1x8x8xf32> -> vector<8x8x8xf32>
    "tpu.trace_start"() <{level = 10 : i32, message = "gqd,gkd->gqk"}> : () -> ()
    %cst_5 = arith.constant dense<0.000000e+00> : vector<8x8x8xf32>
    %57 = tpu.matmul %22, %39, %cst_5 {dimension_numbers = #tpu.dot_dimension_numbers<[2], [2], [1], [1], [0, 0, 0, 1, 1, 1], [0], [0]>} : vector<8x8x8xf32>, vector<8x8x8xf32>, vector<8x8x8xf32> -> vector<8x8x8xf32>
    "tpu.trace_stop"() : () -> ()
    %cst_6 = arith.constant 0.353553385 : f32
    %58 = vector.broadcast %cst_6 : f32 to vector<8x8x8xf32>
    %59 = arith.mulf %57, %58 : vector<8x8x8xf32>
    %c0_7 = arith.constant 0 : index
    %c0_8 = arith.constant 0 : index
    %c0_9 = arith.constant 0 : index
    %60 = vector.load %arg1[%c0_7, %c0_8, %c0_9] : memref<8x1x8xf32, #tpu.memory_space<vmem>>, vector<8x1x8xf32>
    %61 = vector.broadcast %60 : vector<8x1x8xf32> to vector<8x8x8xf32>
    %62 = arith.addf %59, %61 : vector<8x8x8xf32>
    %cst_10 = arith.constant dense<0xFF800000> : vector<8x8xf32>
    %63 = vector.multi_reduction <maximumf>, %62, %cst_10 [2] : vector<8x8x8xf32> to vector<8x8xf32>
    %64 = vector.shape_cast %63 : vector<8x8xf32> to vector<8x8x1xf32>
    %65 = vector.broadcast %64 : vector<8x8x1xf32> to vector<8x8x8xf32>
    %66 = arith.subf %62, %65 : vector<8x8x8xf32>
    %67 = math.exp %66 : vector<8x8x8xf32>
    %cst_11 = arith.constant dense<0.000000e+00> : vector<8x8xf32>
    %68 = vector.multi_reduction <add>, %67, %cst_11 [2] : vector<8x8x8xf32> to vector<8x8xf32>
    %69 = vector.shape_cast %68 : vector<8x8xf32> to vector<8x8x1xf32>
    %70 = tpu.reciprocal %69 {approx = true} : vector<8x8x1xf32> -> vector<8x8x1xf32>
    %71 = vector.broadcast %70 : vector<8x8x1xf32> to vector<8x8x8xf32>
    %72 = arith.mulf %67, %71 : vector<8x8x8xf32>
    "tpu.trace_start"() <{level = 10 : i32, message = "gqk,gkd->gqd"}> : () -> ()
    %cst_12 = arith.constant dense<0.000000e+00> : vector<8x8x8xf32>
    %73 = tpu.matmul %72, %56, %cst_12 {dimension_numbers = #tpu.dot_dimension_numbers<[2], [1], [1], [2], [0, 0, 0, 1, 1, 2], [0], [0]>} : vector<8x8x8xf32>, vector<8x8x8xf32>, vector<8x8x8xf32> -> vector<8x8x8xf32>
    "tpu.trace_stop"() : () -> ()
    %74 = vector.extract_strided_slice %73 {offsets = [0, 0, 0], sizes = [1, 8, 8], strides = [1, 1, 1]} : vector<8x8x8xf32> to vector<1x8x8xf32>
    %75 = vector.shape_cast %74 : vector<1x8x8xf32> to vector<8x8xf32>
    %76 = vector.extract_strided_slice %73 {offsets = [1, 0, 0], sizes = [1, 8, 8], strides = [1, 1, 1]} : vector<8x8x8xf32> to vector<1x8x8xf32>
    %77 = vector.shape_cast %76 : vector<1x8x8xf32> to vector<8x8xf32>
    %78 = vector.extract_strided_slice %73 {offsets = [2, 0, 0], sizes = [1, 8, 8], strides = [1, 1, 1]} : vector<8x8x8xf32> to vector<1x8x8xf32>
    %79 = vector.shape_cast %78 : vector<1x8x8xf32> to vector<8x8xf32>
    %80 = vector.extract_strided_slice %73 {offsets = [3, 0, 0], sizes = [1, 8, 8], strides = [1, 1, 1]} : vector<8x8x8xf32> to vector<1x8x8xf32>
    %81 = vector.shape_cast %80 : vector<1x8x8xf32> to vector<8x8xf32>
    %82 = tpu.concatenate %75, %77, %79, %81 in 1 : vector<8x8xf32>, vector<8x8xf32>, vector<8x8xf32>, vector<8x8xf32> -> vector<8x32xf32>
    %83 = vector.extract_strided_slice %73 {offsets = [4, 0, 0], sizes = [1, 8, 8], strides = [1, 1, 1]} : vector<8x8x8xf32> to vector<1x8x8xf32>
    %84 = vector.shape_cast %83 : vector<1x8x8xf32> to vector<8x8xf32>
    %85 = vector.extract_strided_slice %73 {offsets = [5, 0, 0], sizes = [1, 8, 8], strides = [1, 1, 1]} : vector<8x8x8xf32> to vector<1x8x8xf32>
    %86 = vector.shape_cast %85 : vector<1x8x8xf32> to vector<8x8xf32>
    %87 = vector.extract_strided_slice %73 {offsets = [6, 0, 0], sizes = [1, 8, 8], strides = [1, 1, 1]} : vector<8x8x8xf32> to vector<1x8x8xf32>
    %88 = vector.shape_cast %87 : vector<1x8x8xf32> to vector<8x8xf32>
    %89 = vector.extract_strided_slice %73 {offsets = [7, 0, 0], sizes = [1, 8, 8], strides = [1, 1, 1]} : vector<8x8x8xf32> to vector<1x8x8xf32>
    %90 = vector.shape_cast %89 : vector<1x8x8xf32> to vector<8x8xf32>
    %91 = tpu.concatenate %84, %86, %88, %90 in 1 : vector<8x8xf32>, vector<8x8xf32>, vector<8x8xf32>, vector<8x8xf32> -> vector<8x32xf32>
    %92 = tpu.concatenate %82, %91 in 0 : vector<8x32xf32>, vector<8x32xf32> -> vector<16x32xf32>
    %c0_13 = arith.constant 0 : index
    %c0_14 = arith.constant 0 : index
    %93 = vector.load %arg4[%c0_13, %c0_14] : memref<32x32xf32, #tpu.memory_space<vmem>>, vector<32x32xf32>
    %cst_15 = arith.constant dense<0.000000e+00> : vector<16x32xf32>
    %94 = tpu.matmul %92, %93, %cst_15 {dimension_numbers = #tpu.dot_dimension_numbers<[1], [0], [0], [1], [0, 0, 1, 1], [], []>} : vector<16x32xf32>, vector<32x32xf32>, vector<16x32xf32> -> vector<16x32xf32>
    %c0_16 = arith.constant 0 : index
    %c0_17 = arith.constant 0 : index
    %95 = vector.load %arg5[%c0_16, %c0_17] : memref<1x32xf32, #tpu.memory_space<vmem>>, vector<1x32xf32>
    %96 = vector.broadcast %95 : vector<1x32xf32> to vector<16x32xf32>
    %97 = arith.addf %94, %96 : vector<16x32xf32>
    %98 = arith.addf %97, %0 : vector<16x32xf32>
    %cst_18 = arith.constant dense<0.000000e+00> : vector<16xf32>
    %99 = vector.multi_reduction <add>, %98, %cst_18 [1] : vector<16x32xf32> to vector<16xf32>
    %100 = vector.shape_cast %99 : vector<16xf32> to vector<16x1xf32>
    %cst_19 = arith.constant 3.200000e+01 : f32
    %101 = vector.broadcast %cst_19 : f32 to vector<16x1xf32>
    %102 = arith.divf %100, %101 : vector<16x1xf32>
    %103 = vector.broadcast %102 : vector<16x1xf32> to vector<16x32xf32>
    %104 = arith.subf %98, %103 : vector<16x32xf32>
    %105 = arith.mulf %104, %104 : vector<16x32xf32>
    %cst_20 = arith.constant dense<0.000000e+00> : vector<16xf32>
    %106 = vector.multi_reduction <add>, %105, %cst_20 [1] : vector<16x32xf32> to vector<16xf32>
    %107 = vector.shape_cast %106 : vector<16xf32> to vector<16x1xf32>
    %cst_21 = arith.constant 3.200000e+01 : f32
    %108 = vector.broadcast %cst_21 : f32 to vector<16x1xf32>
    %109 = arith.divf %107, %108 : vector<16x1xf32>
    %110 = vector.broadcast %102 : vector<16x1xf32> to vector<16x32xf32>
    %111 = arith.subf %98, %110 : vector<16x32xf32>
    %cst_22 = arith.constant 9.99999996E-13 : f32
    %112 = vector.broadcast %cst_22 : f32 to vector<16x1xf32>
    %113 = arith.addf %109, %112 : vector<16x1xf32>
    %114 = math.rsqrt %113 : vector<16x1xf32>
    %115 = vector.broadcast %114 : vector<16x1xf32> to vector<16x32xf32>
    %116 = arith.mulf %111, %115 : vector<16x32xf32>
    %c0_23 = arith.constant 0 : index
    %c0_24 = arith.constant 0 : index
    %117 = vector.load %arg6[%c0_23, %c0_24] : memref<1x32xf32, #tpu.memory_space<vmem>>, vector<1x32xf32>
    %118 = vector.broadcast %117 : vector<1x32xf32> to vector<16x32xf32>
    %119 = arith.mulf %116, %118 : vector<16x32xf32>
    %c0_25 = arith.constant 0 : index
    %c0_26 = arith.constant 0 : index
    %120 = vector.load %arg7[%c0_25, %c0_26] : memref<1x32xf32, #tpu.memory_space<vmem>>, vector<1x32xf32>
    %121 = vector.broadcast %120 : vector<1x32xf32> to vector<16x32xf32>
    %122 = arith.addf %119, %121 : vector<16x32xf32>
    %c0_27 = arith.constant 0 : index
    %c0_28 = arith.constant 0 : index
    %123 = vector.load %arg8[%c0_27, %c0_28] : memref<16x32xf32, #tpu.memory_space<vmem>>, vector<16x32xf32>
    tpu.vector_store %arg8[%c0_27, %c0_28], %122 {strides = array<i32>} : memref<16x32xf32, #tpu.memory_space<vmem>>, vector<16x32xf32>,
    return
  }
}

</mosaic_0001>

<bundles_post_ra>
// kernel: tpu_custom_call.1
= control target key start
LH: loop header
LB: loop body
LE: loop exit
PB: predicated region body
PF: predicated region fallthrough
CT: control target
= control target key end

     0   :  { %13 = vsyncpa [#allocation3], 0  ;;  %s1339_s0 = inlined_call_operand.hbm [shape: f32[16,32], index: 0, kind: input, shape index: {}]   ;;  %s1340_s1 = inlined_call_operand.hbm [shape: f32[8,1,8], index: 1, kind: input, shape index: {}]   ;;  %s1341_s2 = inlined_call_operand.hbm [shape: f32[32,96], index: 2, kind: input, shape index: {}]   ;;  %s1342_s3 = inlined_call_operand.vmem [shape: f32[1,96], index: 3, kind: input, shape index: {}]   ;;  %s1343_s4 = inlined_call_operand.hbm [shape: f32[32,32], index: 4, kind: input, shape index: {}]   ;;  %s1344_s5 = inlined_call_operand.vmem [shape: f32[1,32], index: 5, kind: input, shape index: {}]   ;;  %s1345_s6 = inlined_call_operand.vmem [shape: f32[1,32], index: 6, kind: input, shape index: {}]   ;;  %s1346_s7 = inlined_call_operand.vmem [shape: f32[1,32], index: 7, kind: input, shape index: {}]   ;;  %s1347_s8 = inlined_call_operand.hbm [shape: f32[16,32], index: 8, kind: output, shape index: {}]  }
   0x1   :  { %14 = vsyncpa [#allocation6], 0 }
   0x2   :  { %15 = vsyncpa [#allocation9], 0  ;;  %s34_s29 = sshll.u32 %s1340_s1, 4  ;;  %s35_s29 = int_to_ptr.hbm [resolvable:$true] %s34_s29 }
   0x3   :  { %16 = vsyncpa [#allocation4], 0  ;;  %s1094_s30 = smov [#allocation5]   ;;  %s21_s12 = sshll.u32 %s1339_s0, 4  ;;  %s22_s12 = int_to_ptr.hbm [resolvable:$true] %s21_s12 }
   0x4   :  { %s36_s9 = sshll.u32 %s1094_s30, 4  ;;  %s1095_s13 = smov 16   ;;  %s37_s9 = int_to_ptr.vmem [resolvable:$true] %s36_s9 }
   0x5   :  { %s1096_s14 = smov 1   ;;  %s1097_s15 = smov [#allocation2]  }
   0x6   :  { %42 = dma.hbm_to_vmem [thread:$0]  %s35_s29, 128, %s37_s9, [#allocation6], %s1095_s13, %s1095_s13, %s1096_s14  }
   0x7   :  { %s23_s16 = sshll.u32 %s1097_s15, 4  ;;  %s1098_s17 = smov 128   ;;  %s24_s16 = int_to_ptr.vmem [resolvable:$true] %s23_s16 }
   0x8   :  { %s1099_s1 = smov 8   ;;  %s47_s20 = sshll.u32 %s1341_s2, 4  ;;  %s48_s20 = int_to_ptr.hbm [resolvable:$true] %s47_s20 }
   0x9   :  { %29 = dma.hbm_to_vmem [thread:$0]  %s22_s12, 256, %s24_s16, [#allocation3], %s1098_s17, %s1098_s17, %s1099_s1  }
   0xa   :  { %s1100_s0 = smov [#allocation7]   ;;  %s62_s24 = sshll.u32 %s1343_s4, 4  ;;  %s63_s24 = int_to_ptr.hbm [resolvable:$true] %s62_s24 }
   0xb   :  { %s49_s21 = sshll.u32 %s1100_s0, 4  ;;  %s1101_s25 = smov [#allocation8]   ;;  %s50_s21 = int_to_ptr.vmem [resolvable:$true] %s49_s21 }
   0xc   :  { %55 = dma.hbm_to_vmem [thread:$0]  %s48_s20, 512, %s50_s21, [#allocation6], %s1098_s17, %s1098_s17, %s1099_s1  }
   0xd   :  { %s64_s26 = sshll.u32 %s1101_s25, 4  ;;  %s65_s26 = int_to_ptr.vmem [resolvable:$true] %s64_s26 }
   0xe   :  { %70 = dma.hbm_to_vmem [thread:$0]  %s63_s24, 512, %s65_s26, [#allocation9], %s1098_s17, %s1098_s17, %s1099_s1  }
   0xf   :  { %1086 = dma.done.wait [#allocation3], 256  }
  0x10   :  { %1087 = vsyncadd [#allocation3], 4294967040 }
  0x11   :  { %1088 = dma.done.wait [#allocation6], 640  }
  0x12   :  { %1089 = vsyncadd [#allocation6], 4294966656 }
  0x13   :  { %1090 = dma.done.wait [#allocation9], 512  }
  0x14   :  { %1091 = vsyncadd [#allocation9], 4294966784  ;;  %v98_v0 = vld [vmem:[#allocation7 + $0x18] sm:$0xff]  ;;  %v97_v1 = vld [vmem:[#allocation7 + $0x10] sm:$0xff]  ;;  %vm103_vm0 = vcmask 261120   ;;  %s1102_s27 = smov 120  }
  0x15   :  { %122 = vmatpush.msra.mxu0 %v98_v0  ;;  %v96_v2 = vld [vmem:[#allocation7 + $0x8] sm:$0xff]  ;;  %v95_v3 = vld [vmem:[#allocation7] sm:$0xff]  ;;  %v1182_v5 = vld [vmem:[#allocation2 + $0x8] sm:$0xff]  ;;  %s1103_s28 = smov 104   ;;  %s1104_s29 = smov 112   ;;  %vm149_vm1 = vcmask 64512  }
  0x16   :  { %v1178_v4 = vld [vmem:[#allocation2] sm:$0xff]  ;;  %v917_v25 = vld [vmem:[#allocation5 + $0x2] ss:$0 sm:$0xff]  ;;  %v918_v32 = vld [vmem:[#allocation5] ss:$0 sm:$0xff]  ;;  %s1106_s30 = smov 64  }
  0x17   :  { %123 = vmatpush.msra.mxu0 %v97_v1  ;;  %v916_v6 = vld [vmem:[%s1342_s3] ss:$0 sm:$0xff]  ;;  %s1105_s3 = smov 96   ;;  %v919_v35 = vld [vmem:[#allocation5 + $0x1] ss:$0 sm:$0xff]  ;;  %s1107_s9 = smov 24  }
  0x18   :  { %v920_v38 = vld [vmem:[#allocation5 + $0x3] ss:$0 sm:$0xff]  ;;  %v921_v45 = vld [vmem:[#allocation5 + $0x6] ss:$0 sm:$0xff]  ;;  %v922_v50 = vld [vmem:[#allocation5 + $0x5] ss:$0 sm:$0xff] }
  0x19   :  { %124 = vmatpush.msra.mxu0 %v96_v2  ;;  %v923_v57 = vld [vmem:[#allocation5 + $0x4] ss:$0 sm:$0xff]  ;;  %v924_v62 = vld [vmem:[#allocation5 + $0x7] ss:$0 sm:$0xff]  ;;  %vm713_vm2 = vcmask 130048   ;;  %vm715_vm3 = vcmask 195584  }
  0x1a   :  { %s842_s18 = sshll.u32 %s1347_s8, 4  ;;  %s843_s18 = int_to_ptr.hbm [resolvable:$true] %s842_s18 }
  0x1b   :  { %125 = vmatpush.msra.mxu0 %v95_v3 }
  0x1c   :  { %857 = vmatmul.msk.f32.vlgmr.msra.gmra.mxu0 %vm103_vm0, %v1178_v4 }
  0x24   :  { %858 = vmatmul.msk.f32.gmra.mxu0 %vm103_vm0, %v1182_v5 }
  0x99   :  { %v127_v7 = vpop.f32.mrf.mxu0 }
  0x9a   :  { %v1189_v8 = vadd.f32 %v916_v6, %v127_v7 }
  0x9c   :  { %134 = vrot.lane.b32.xlu0 %v1189_v8, %s1102_s27 }
  0xa1   :  { %v130_v9 = vpop.f32.mrf.mxu0 }
  0xa2   :  { %v1192_v10 = vadd.f32 %v916_v6, %v130_v9 }
  0xa4   :  { %141 = vrot.lane.b32.xlu2 %v1192_v10, %s1102_s27  ;;  %145 = vrot.lane.b32.xlu1 %v1192_v10, %s1103_s28 }
  0xa5   :  { %138 = vrot.lane.b32.xlu0 %v1189_v8, %s1103_s28 }
  0xac   :  { %143 = vrot.lane.b32.xlu2 %v1192_v10, %s1104_s29  ;;  %136 = vrot.lane.b32.xlu1 %v1189_v8, %s1104_s29 }
  0xb4   :  { %252 = vrot.lane.b32.xlu2 %v1192_v10, %s1105_s3  ;;  %147 = vrot.lane.b32.xlu1 %v1189_v8, %s1105_s3 }
  0xfe   :  { %v1204_v12 = vpop.permute.xlu2 %141 }
 0x106   :  { %v1212_v15 = vpop.permute.xlu2 %143 }
 0x10e   :  { %v1201_v11 = vpop.permute.xlu0 %134  ;;  %v253_v18 = vpop.permute.xlu2 %252 }
 0x10f   :  { %174 = vrot.lane.b32.xlu0 %v1201_v11, %s1105_s3 }
 0x116   :  { %v1206_v13 = vpop.permute.xlu1 %145 }
 0x117   :  { %v1208_v14 = vpop.permute.xlu0 %138  ;;  %330 = vrot.lane.b32.xlu1 %v1206_v13, %s1105_s3 }
 0x118   :  { %226 = vrot.lane.b32.xlu0 %v1208_v14, %s1105_s3 }
 0x11e   :  { %v1214_v16 = vpop.permute.xlu1 %136 }
 0x11f   :  { %304 = vrot.lane.b32.xlu1 %v1212_v15, %s1105_s3  ;;  %200 = vrot.lane.b32.xlu2 %v1214_v16, %s1105_s3 }
 0x120   :  { %278 = vrot.lane.b32.xlu0 %v1204_v12, %s1105_s3 }
 0x126   :  { %v148_v17 = vpop.permute.xlu1 %147 }
 0x127   :  { %859 = vmatpush.xpose.msk.msra.mxu1 %vm149_vm1, %v148_v17 }
 0x12a   :  { %860 = vmatmul.msk.f32.vlgmr.msra.gmra.mxu1 %vm149_vm1, %v1189_v8 }
 0x179   :  { %v201_v19 = vpop.permute.xlu2 %200 }
 0x17a   :  { %863 = vmatpush.xpose.msk.msrb.mxu0 %vm149_vm1, %v201_v19 }
 0x17d   :  { %864 = vmatmul.msk.f32.vlgmr.msrb.gmra.mxu0 %vm149_vm1, %v1214_v16 }
 0x181   :  { %v175_v20 = vpop.permute.xlu0 %174 }
 0x182   :  { %861 = vmatpush.xpose.msk.msra.mxu2 %vm149_vm1, %v175_v20 }
 0x185   :  { %862 = vmatmul.msk.f32.vlgmr.msra.gmra.mxu2 %vm149_vm1, %v1201_v11 }
 0x186   :  { %867 = vmatpush.xpose.msk.msrb.mxu2 %vm149_vm1, %v253_v18 }
 0x189   :  { %v331_v21 = vpop.permute.xlu1 %330 }
 0x18a   :  { %v227_v22 = vpop.permute.xlu0 %226  ;;  %873 = vmatpush.xpose.msk.msra.mxu2 %vm149_vm1, %v331_v21 }
 0x18b   :  { %865 = vmatpush.xpose.msk.msrb.mxu1 %vm149_vm1, %v227_v22 }
 0x18d   :  { %868 = vmatmul.msk.f32.vlgmr.msrb.gmra.mxu2 %vm149_vm1, %v1192_v10 }
 0x18e   :  { %866 = vmatmul.msk.f32.vlgmr.msrb.gmra.mxu1 %vm149_vm1, %v1208_v14 }
 0x191   :  { %v305_v23 = vpop.permute.xlu1 %304 }
 0x192   :  { %v279_v24 = vpop.permute.xlu0 %278  ;;  %871 = vmatpush.xpose.msk.msra.mxu1 %vm149_vm1, %v305_v23 }
 0x193   :  { %869 = vmatpush.xpose.msk.msra.mxu3 %vm149_vm1, %v279_v24 }
 0x195   :  { %874 = vmatmul.msk.f32.vlgmr.msra.gmra.mxu2 %vm149_vm1, %v1206_v13 }
 0x196   :  { %870 = vmatmul.msk.f32.vlgmr.msra.gmra.mxu3 %vm149_vm1, %v1204_v12  ;;  %872 = vmatmul.msk.f32.vlgmr.msra.gmra.mxu1 %vm149_vm1, %v1212_v15 }
 0x1a7   :  { %v171_v28 = vpop.f32.mrf.mxu1 }
 0x1a8   :  { %v356_v30 = vmul.f32 0.35355338, %v171_v28 }
 0x1aa   :  { %v1244_v33 = vadd.f32 %v918_v32, %v356_v30  ;;  %v906_v30 = vpack.i.bf16 %v1206_v13, %v1214_v16 }
 0x1ac   :  { %v404_v34 = vsel %vm149_vm1, %v1244_v33, -inf }
 0x1fa   :  { %v223_v26 = vpop.f32.mrf.mxu0 }
 0x1fb   :  { %v358_v27 = vmul.f32 0.35355338, %v223_v26 }
 0x1fd   :  { %v398_v29 = vadd.f32 %v917_v25, %v358_v27 }
 0x1ff   :  { %v410_v31 = vsel %vm149_vm1, %v398_v29, -inf }
 0x200   :  { %411 = vmax.xlane.f32.xlu1 %v410_v31 }
 0x208   :  { %405 = vmax.xlane.f32.xlu1 %v404_v34  ;;  %v197_v36 = vpop.f32.mrf.mxu2 }
 0x209   :  { %v357_v37 = vmul.f32 0.35355338, %v197_v36 }
 0x20b   :  { %v249_v39 = vpop.f32.mrf.mxu1  ;;  %v397_v40 = vadd.f32 %v919_v35, %v357_v37  ;;  %v901_v37 = vpack.i.bf16 %v1201_v11, %v1208_v14  ;;  %v911_v11 = vpack.i.bf16 %v1212_v15, %v1204_v12 }
 0x20c   :  { %v359_v41 = vmul.f32 0.35355338, %v249_v39 }
 0x20d   :  { %v407_v42 = vsel %vm149_vm1, %v397_v40, -inf }
 0x20e   :  { %408 = vmax.xlane.f32.xlu0 %v407_v42  ;;  %v399_v43 = vadd.f32 %v920_v38, %v359_v41 }
 0x210   :  { %v413_v44 = vsel %vm149_vm1, %v399_v43, -inf  ;;  %v275_v51 = vpop.f32.mrf.mxu2 }
 0x211   :  { %414 = vmax.xlane.f32.xlu2 %v413_v44  ;;  %v360_v55 = vmul.f32 0.35355338, %v275_v51 }
 0x213   :  { %v327_v46 = vpop.f32.mrf.mxu1  ;;  %v1252_v58 = vadd.f32 %v923_v57, %v360_v55 }
 0x214   :  { %v362_v47 = vmul.f32 0.35355338, %v327_v46 }
 0x215   :  { %v416_v61 = vsel %vm149_vm1, %v1252_v58, -inf }
 0x216   :  { %v402_v48 = vadd.f32 %v921_v45, %v362_v47 }
 0x218   :  { %v422_v49 = vsel %vm149_vm1, %v402_v48, -inf  ;;  %v353_v59 = vpop.f32.mrf.mxu2 }
 0x219   :  { %423 = vmax.xlane.f32.xlu0 %v422_v49  ;;  %v301_v52 = vpop.f32.mrf.mxu3  ;;  %v363_v60 = vmul.f32 0.35355338, %v353_v59 }
 0x21a   :  { %v361_v53 = vmul.f32 0.35355338, %v301_v52 }
 0x21b   :  { %v403_v63 = vadd.f32 %v924_v62, %v363_v60 }
 0x21c   :  { %v401_v54 = vadd.f32 %v922_v50, %v361_v53 }
 0x21d   :  { %v425_v0 = vsel %vm149_vm1, %v403_v63, -inf }
 0x21e   :  { %v419_v56 = vsel %vm149_vm1, %v401_v54, -inf }
 0x21f   :  { %420 = vmax.xlane.f32.xlu2 %v419_v56 }
 0x227   :  { %417 = vmax.xlane.f32.xlu2 %v416_v61 }
 0x22f   :  { %426 = vmax.xlane.f32.xlu2 %v425_v0 }
 0x273   :  { %v412_v1 = vpop.xlane.xlu1 %411 }
 0x274   :  { %v430_v2 = vsub.f32 %v398_v29, %v412_v1 }
 0x276   :  { %v440_v3 = vmul.f32 1.442695, %v430_v2 }
 0x278   :  { %928 = vpow2.f32 %v440_v3 }
 0x27b   :  { %v406_v41 = vpop.xlane.xlu1 %405 }
 0x27e   :  { %v1257_v6 = vpop.eup %928 }
 0x27f   :  { %v458_v7 = vsel %vm149_vm1, %v1257_v6, 0.0 }
 0x280   :  { %459 = vadd.xlane.f32.xlu2 %v458_v7 }
 0x281   :  { %v409_v9 = vpop.xlane.xlu0 %408 }
 0x282   :  { %v429_v17 = vsub.f32 %v397_v40, %v409_v9 }
 0x284   :  { %v438_v18 = vmul.f32 1.442695, %v429_v17  ;;  %v415_v19 = vpop.xlane.xlu2 %414 }
 0x285   :  { %v431_v20 = vsub.f32 %v399_v43, %v415_v19  ;;  %v428_v43 = vsub.f32 %v1244_v33, %v406_v41 }
 0x286   :  { %930 = vpow2.f32 %v438_v18 }
 0x287   :  { %v442_v21 = vmul.f32 1.442695, %v431_v20  ;;  %v436_v14 = vmul.f32 1.442695, %v428_v43 }
 0x289   :  { %932 = vpow2.f32 %v442_v21 }
 0x28c   :  { %v1261_v22 = vpop.eup %930  ;;  %v424_v23 = vpop.xlane.xlu0 %423 }
 0x28d   :  { %v434_v24 = vsub.f32 %v402_v48, %v424_v23  ;;  %v455_v25 = vsel %vm149_vm1, %v1261_v22, 0.0 }
 0x28e   :  { %456 = vadd.xlane.f32.xlu1 %v455_v25 }
 0x28f   :  { %v1265_v26 = vpop.eup %932  ;;  %v448_v27 = vmul.f32 1.442695, %v434_v24 }
 0x290   :  { %v461_v28 = vsel %vm149_vm1, %v1265_v26, 0.0 }
 0x291   :  { %934 = vpow2.f32 %v448_v27  ;;  %462 = vadd.xlane.f32.xlu0 %v461_v28 }
 0x292   :  { %v421_v29 = vpop.xlane.xlu2 %420 }
 0x293   :  { %v433_v39 = vsub.f32 %v401_v54, %v421_v29 }
 0x295   :  { %v446_v40 = vmul.f32 1.442695, %v433_v39 }
 0x297   :  { %v1271_v31 = vpop.eup %934 }
 0x298   :  { %907 = vrot.lane.b32.xlu2 %v906_v30, %s1106_s30  ;;  %v470_v32 = vsel %vm149_vm1, %v1271_v31, 0.0 }
 0x299   :  { %471 = vadd.xlane.f32.xlu0 %v470_v32 }
 0x29a   :  { %v418_v34 = vpop.xlane.xlu2 %417 }
 0x29b   :  { %v432_v33 = vsub.f32 %v1252_v58, %v418_v34  ;;  %v735_v34 = vld [vmem:[#allocation8 + $0x18] sm:$0xff] }
 0x29d   :  { %v444_v47 = vmul.f32 1.442695, %v432_v33 }
 0x2a2   :  { %v427_v35 = vpop.xlane.xlu2 %426 }
 0x2a3   :  { %v435_v36 = vsub.f32 %v403_v63, %v427_v35  ;;  %v734_v35 = vld [vmem:[#allocation8 + $0x10] sm:$0xff] }
 0x2a5   :  { %v450_v38 = vmul.f32 1.442695, %v435_v36  ;;  %v733_v36 = vld [vmem:[#allocation8 + $0x8] sm:$0xff] }
 0x2a7   :  { %936 = vpow2.f32 %v450_v38  ;;  %902 = vrot.lane.b32.xlu1 %v901_v37, %s1106_s30  ;;  %v732_v37 = vld [vmem:[#allocation8] sm:$0xff] }
 0x2a8   :  { %938 = vpow2.f32 %v446_v40 }
 0x2a9   :  { %940 = vpow2.f32 %v436_v14 }
 0x2aa   :  { %942 = vpow2.f32 %v444_v47  ;;  %v925_v47 = vld [vmem:[%s1344_s5] ss:$0 sm:$0xff] }
 0x2ad   :  { %v937_v13 = vpop.eup %936 }
 0x2ae   :  { %v473_v16 = vsel %vm149_vm1, %v937_v13, 0.0  ;;  %v939_v42 = vpop.eup %938 }
 0x2af   :  { %474 = vadd.xlane.f32.xlu0 %v473_v16  ;;  %v467_v44 = vsel %vm149_vm1, %v939_v42, 0.0  ;;  %v1285_v45 = vpop.eup %940 }
 0x2b0   :  { %v452_v46 = vsel %vm149_vm1, %v1285_v45, 0.0  ;;  %v943_v12 = vpop.eup %942 }
 0x2b1   :  { %v464_v15 = vsel %vm149_vm1, %v943_v12, 0.0 }
 0x2c1   :  { %468 = vadd.xlane.f32.xlu2 %v467_v44 }
 0x2c3   :  { %912 = vrot.lane.b32.xlu0 %v911_v11, %s1106_s30 }
 0x2d1   :  { %453 = vadd.xlane.f32.xlu1 %v452_v46 }
 0x2d9   :  { %492 = vrot.lane.b32.xlu2 %v1189_v8, %s1106_s30 }
 0x2e1   :  { %596 = vrot.lane.b32.xlu2 %v1192_v10, %s1106_s30 }
 0x2ed   :  { %465 = vadd.xlane.f32.xlu0 %v464_v15 }
 0x2f3   :  { %v460_v48 = vpop.xlane.xlu2 %459 }
 0x2f4   :  { %944 = vrcp.f32 %v460_v48 }
 0x2fa   :  { %v945_v49 = vpop.eup %944 }
 0x2fb   :  { %v908_v50 = vpop.permute.xlu2 %907  ;;  %v486_v52 = vmul.f32 %v945_v49, %v1257_v6 }
 0x2fc   :  { %v909_v51 = vunpack.i.l.bf16 %v908_v50  ;;  %v910_v61 = vunpack.i.h.bf16 %v908_v50 }
 0x2fe   :  { %565 = vmatpush.msrb.mxu1 %v909_v51 }
 0x2ff   :  { %877 = vmatmul.msk.f32.vlgmr.msrb.gmra.mxu1 %vm149_vm1, %v486_v52 }
 0x301   :  { %v457_v8 = vpop.xlane.xlu1 %456 }
 0x302   :  { %946 = vrcp.f32 %v457_v8 }
 0x304   :  { %v463_v53 = vpop.xlane.xlu0 %462 }
 0x305   :  { %948 = vrcp.f32 %v463_v53  ;;  %v1108_v53 = vmov 32.0  }
 0x308   :  { %v947_v10 = vpop.eup %946 }
 0x309   :  { %v485_v59 = vmul.f32 %v947_v10, %v1261_v22 }
 0x30b   :  { %v949_v54 = vpop.eup %948 }
 0x30c   :  { %v472_v56 = vpop.xlane.xlu0 %471  ;;  %v487_v60 = vmul.f32 %v949_v54, %v1265_v26 }
 0x319   :  { %v903_v55 = vpop.permute.xlu1 %902 }
 0x31a   :  { %v905_v57 = vunpack.i.h.bf16 %v903_v55  ;;  %v904_v58 = vunpack.i.l.bf16 %v903_v55 }
 0x31c   :  { %539 = vmatpush.msra.mxu0 %v905_v57  ;;  %591 = vmatpush.msrb.mxu2 %v904_v58 }
 0x31d   :  { %876 = vmatmul.msk.f32.vlgmr.msra.gmra.mxu0 %vm149_vm1, %v485_v59  ;;  %878 = vmatmul.msk.f32.vlgmr.msrb.gmra.mxu2 %vm149_vm1, %v487_v60 }
 0x31e   :  { %695 = vmatpush.msra.mxu2 %v910_v61 }
 0x322   :  { %v475_v62 = vpop.xlane.xlu0 %474 }
 0x323   :  { %950 = vrcp.f32 %v475_v62 }
 0x324   :  { %952 = vrcp.f32 %v472_v56 }
 0x329   :  { %v951_v63 = vpop.eup %950 }
 0x32a   :  { %v491_v0 = vmul.f32 %v951_v63, %v937_v13  ;;  %v953_v1 = vpop.eup %952 }
 0x32b   :  { %v490_v9 = vmul.f32 %v953_v1, %v1271_v31 }
 0x32c   :  { %882 = vmatmul.msk.f32.vlgmr.msra.gmra.mxu2 %vm149_vm1, %v491_v0 }
 0x334   :  { %v469_v2 = vpop.xlane.xlu2 %468 }
 0x335   :  { %954 = vrcp.f32 %v469_v2  ;;  %v913_v3 = vpop.permute.xlu0 %912 }
 0x336   :  { %v915_v6 = vunpack.i.h.bf16 %v913_v3  ;;  %v914_v7 = vunpack.i.l.bf16 %v913_v3 }
 0x338   :  { %643 = vmatpush.msrb.mxu0 %v914_v7  ;;  %669 = vmatpush.msra.mxu1 %v915_v6 }
 0x339   :  { %881 = vmatmul.msk.f32.vlgmr.msra.gmra.mxu1 %vm149_vm1, %v490_v9 }
 0x33b   :  { %v955_v17 = vpop.eup %954 }
 0x33c   :  { %v489_v18 = vmul.f32 %v955_v17, %v939_v42  ;;  %v493_v19 = vpop.permute.xlu2 %492 }
 0x33d   :  { %513 = vmatpush.msrb.mxu3 %v493_v19 }
 0x33e   :  { %880 = vmatmul.msk.f32.vlgmr.msrb.gmra.mxu0 %vm149_vm1, %v489_v18 }
 0x344   :  { %v597_v20 = vpop.permute.xlu2 %596  ;;  %v454_v21 = vpop.xlane.xlu1 %453 }
 0x345   :  { %956 = vrcp.f32 %v454_v21  ;;  %617 = vmatpush.msra.mxu3 %v597_v20 }
 0x34b   :  { %v957_v22 = vpop.eup %956 }
 0x34c   :  { %v484_v23 = vmul.f32 %v957_v22, %v1285_v45  ;;  %v926_v22 = vld [vmem:[%s1345_s6] ss:$0 sm:$0xff]  ;;  %s1109_s6 = smov [#allocation10]  }
 0x34e   :  { %875 = vmatmul.msk.f32.vlgmr.msrb.gmra.mxu3 %vm149_vm1, %v484_v23 }
 0x34f   :  { %758 = vmatpush.msrb.mxu3 %v735_v34 }
 0x351   :  { %759 = vmatpush.msrb.mxu3 %v734_v35 }
 0x353   :  { %760 = vmatpush.msrb.mxu3 %v733_v36 }
 0x355   :  { %761 = vmatpush.msrb.mxu3 %v732_v37 }
 0x360   :  { %v466_v24 = vpop.xlane.xlu0 %465 }
 0x361   :  { %958 = vrcp.f32 %v466_v24 }
 0x362   :  { %960 = vrcp.f32 %v1108_v53 }
 0x367   :  { %v959_v25 = vpop.eup %958 }
 0x368   :  { %v488_v26 = vmul.f32 %v959_v25, %v943_v12  ;;  %v961_v10 = vpop.eup %960 }
 0x369   :  { %v778_v54 = vmul.f32 32.0, %v961_v10  ;;  %vm782_vm4 = vweird.f32 %v961_v10 }
 0x36a   :  { %879 = vmatmul.msk.f32.vlgmr.msra.gmra.mxu3 %vm149_vm1, %v488_v26  ;;  %v927_v26 = vld [vmem:[%s1346_s7] ss:$0 sm:$0xff]  ;;  %s840_s7 = sshll.u32 %s1109_s6, 4  ;;  %s841_s7 = int_to_ptr.vmem [resolvable:$true] %s840_s7 }
 0x36b   :  { %v779_v55 = vsub.f32 1.0, %v778_v54 }
 0x36d   :  { %v780_v56 = vmul.f32 %v961_v10, %v779_v55 }
 0x36f   :  { %v781_v57 = vadd.f32 %v961_v10, %v780_v56 }
 0x371   :  { %v783_v58 = vsel %vm782_vm4, %v961_v10, %v781_v57 }
 0x37c   :  { %v567_v27 = vpop.f32.mrf.mxu1 }
 0x37d   :  { %705 = vrot.lane.b32.xlu2 %v567_v27, %s1095_s13 }
 0x39a   :  { %v541_v28 = vpop.f32.mrf.mxu0 }
 0x39b   :  { %701 = vrot.lane.b32.xlu2 %v541_v28, %s1099_s1 }
 0x3a0   :  { %v593_v29 = vpop.f32.mrf.mxu2 }
 0x3a1   :  { %709 = vrot.lane.b32.xlu1 %v593_v29, %s1107_s9 }
 0x3af   :  { %v697_v32 = vpop.f32.mrf.mxu2 }
 0x3b6   :  { %v671_v30 = vpop.f32.mrf.mxu1 }
 0x3b7   :  { %722 = vrot.lane.b32.xlu0 %v671_v30, %s1095_s13 }
 0x3bb   :  { %v645_v31 = vpop.f32.mrf.mxu0 }
 0x3bc   :  { %718 = vrot.lane.b32.xlu2 %v645_v31, %s1099_s1 }
 0x3c4   :  { %726 = vrot.lane.b32.xlu2 %v697_v32, %s1107_s9 }
 0x3d1   :  { %v515_v16 = vpop.f32.mrf.mxu3 }
 0x3d7   :  { %v706_v38 = vpop.permute.xlu2 %705 }
 0x3ed   :  { %v619_v44 = vpop.f32.mrf.mxu3 }
 0x3f5   :  { %v702_v13 = vpop.permute.xlu2 %701 }
 0x3f6   :  { %v712_v39 = vsel %vm149_vm1, %v515_v16, %v702_v13 }
 0x3f7   :  { %v714_v40 = vsel %vm713_vm2, %v712_v39, %v706_v38 }
 0x413   :  { %v710_v41 = vpop.permute.xlu1 %709 }
 0x414   :  { %v716_v42 = vsel %vm715_vm3, %v714_v40, %v710_v41 }
 0x415   :  { %883 = vmatmul.msk.f32.vlgmr.msrb.gmra.mxu3 %vm103_vm0, %v716_v42 }
 0x416   :  { %v719_v43 = vpop.permute.xlu2 %718 }
 0x417   :  { %v729_v11 = vsel %vm149_vm1, %v619_v44, %v719_v43 }
 0x41e   :  { %v727_v45 = vpop.permute.xlu2 %726 }
 0x429   :  { %v723_v14 = vpop.permute.xlu0 %722 }
 0x42a   :  { %v730_v46 = vsel %vm713_vm2, %v729_v11, %v723_v14 }
 0x42b   :  { %v731_v33 = vsel %vm715_vm3, %v730_v46, %v727_v45 }
 0x42c   :  { %884 = vmatmul.msk.f32.gmra.mxu3 %vm103_vm0, %v731_v33 }
 0x498   :  { %v763_v12 = vpop.f32.mrf.mxu3 }
 0x499   :  { %v764_v15 = vadd.f32 %v925_v47, %v763_v12 }
 0x49b   :  { %v769_v48 = vadd.f32 %v764_v15, %v1178_v4 }
 0x49d   :  { %v771_v49 = vsel %vm103_vm0, %v769_v48, 0.0 }
 0x49e   :  { %772 = vadd.xlane.f32.xlu2 %v771_v49 }
 0x4af   :  { %v766_v50 = vpop.f32.mrf.mxu3 }
 0x4b0   :  { %v767_v51 = vadd.f32 %v925_v47, %v766_v50 }
 0x4b2   :  { %v770_v52 = vadd.f32 %v767_v51, %v1182_v5 }
 0x4b4   :  { %v774_v8 = vsel %vm103_vm0, %v770_v52, 0.0 }
 0x4b5   :  { %775 = vadd.xlane.f32.xlu1 %v774_v8 }
 0x511   :  { %v773_v4 = vpop.xlane.xlu2 %772 }
 0x512   :  { %v784_v59 = vmul.f32 %v783_v58, %v773_v4 }
 0x514   :  { %v786_v60 = vsub.f32 %v769_v48, %v784_v59 }
 0x516   :  { %v788_v61 = vmul.f32 %v786_v60, %v786_v60 }
 0x518   :  { %v790_v62 = vsel %vm103_vm0, %v788_v61, 0.0 }
 0x519   :  { %791 = vadd.xlane.f32.xlu0 %v790_v62 }
 0x528   :  { %v776_v5 = vpop.xlane.xlu1 %775 }
 0x529   :  { %v785_v63 = vmul.f32 %v783_v58, %v776_v5 }
 0x52b   :  { %v787_v0 = vsub.f32 %v770_v52, %v785_v63 }
 0x52d   :  { %v789_v1 = vmul.f32 %v787_v0, %v787_v0 }
 0x52f   :  { %v793_v2 = vsel %vm103_vm0, %v789_v1, 0.0 }
 0x530   :  { %794 = vadd.xlane.f32.xlu2 %v793_v2 }
 0x58c   :  { %v792_v3 = vpop.xlane.xlu0 %791 }
 0x58d   :  { %v796_v6 = vmul.f32 %v792_v3, %v783_v58 }
 0x58f   :  { %v798_v7 = vadd.f32 1e-12, %v796_v6 }
 0x591   :  { %962 = vrsqrt.f32 %v798_v7  ;;  %vm806_vm6 = vweird.f32 %v798_v7 }
 0x597   :  { %v963_v9 = vpop.eup %962 }
 0x598   :  { %v801_v17 = vmul.f32 %v963_v9, %v798_v7  ;;  %vm807_vm5 = vweird.f32 %v963_v9 }
 0x599   :  { %vm808_vm7 = vmor %vm806_vm6, %vm807_vm5 }
 0x59a   :  { %v802_v18 = vmul.f32 %v963_v9, %v801_v17 }
 0x59c   :  { %v803_v19 = vmul.f32 0.5, %v802_v18 }
 0x59e   :  { %v804_v20 = vsub.f32 1.5, %v803_v19 }
 0x5a0   :  { %v805_v21 = vmul.f32 %v963_v9, %v804_v20 }
 0x5a2   :  { %v809_v23 = vsel %vm808_vm7, %v963_v9, %v805_v21 }
 0x5a3   :  { %v820_v24 = vmul.f32 %v809_v23, %v786_v60  ;;  %v795_v25 = vpop.xlane.xlu2 %794 }
 0x5a4   :  { %v797_v27 = vmul.f32 %v795_v25, %v783_v58 }
 0x5a5   :  { %v826_v28 = vmul.f32 %v926_v22, %v820_v24 }
 0x5a6   :  { %v799_v29 = vadd.f32 1e-12, %v797_v27 }
 0x5a7   :  { %v832_v30 = vadd.f32 %v927_v26, %v826_v28 }
 0x5a8   :  { %964 = vrsqrt.f32 %v799_v29  ;;  %vm816_vm9 = vweird.f32 %v799_v29 }
 0x5a9   :  { %834 = vst.msk [vmem:[#allocation10] sm:$0xff] %vm103_vm0, %v832_v30 }
 0x5ae   :  { %v965_v31 = vpop.eup %964 }
 0x5af   :  { %v811_v32 = vmul.f32 %v965_v31, %v799_v29  ;;  %vm817_vm8 = vweird.f32 %v965_v31 }
 0x5b0   :  { %vm818_vm10 = vmor %vm816_vm9, %vm817_vm8 }
 0x5b1   :  { %v812_v34 = vmul.f32 %v965_v31, %v811_v32 }
 0x5b3   :  { %v813_v35 = vmul.f32 0.5, %v812_v34 }
 0x5b5   :  { %v814_v36 = vsub.f32 1.5, %v813_v35 }
 0x5b7   :  { %v815_v37 = vmul.f32 %v965_v31, %v814_v36 }
 0x5b9   :  { %v819_v38 = vsel %vm818_vm10, %v965_v31, %v815_v37 }
 0x5ba   :  { %v821_v13 = vmul.f32 %v819_v38, %v787_v0 }
 0x5bc   :  { %v827_v16 = vmul.f32 %v926_v22, %v821_v13 }
 0x5be   :  { %v833_v39 = vadd.f32 %v927_v26, %v827_v16 }
 0x5c0   :  { %835 = vst.msk [vmem:[#allocation10 + $0x8] sm:$0xff] %vm103_vm0, %v833_v39 }
 0x5c1   :  { %848 = dma.vmem_to_hbm [thread:$0]  %s841_s7, 256, %s843_s18, [#allocation4], %s1098_s17, %s1098_s17, %s1099_s1  }
 0x5c2   :  { %1092 = dma.done.wait [#allocation4], 256  }
 0x5c3   :  { %1093 = vsyncadd [#allocation4], 4294967040 }
 0x5c4   :  { %853 = vsyncpa [#allocation3], 1 }
 0x5c5   :  { %854 = vsyncpa [#allocation6], 1 }
 0x5c6   :  { %855 = vsyncpa [#allocation9], 1 }
 0x5c7   :  { %856 = vsyncpa [#allocation4], 1 }

</bundles_post_ra>
